<compile_context>
chip_gen: v5e
topology: v5e:2x2
jax: 0.10.0
libtpu: 0.0.40
codegen_flags: <defaults>
</compile_context>

<pallas_src>
import jax
import jax.numpy as jnp
from jax import lax
from jax.experimental import pallas as pl
from jax.experimental.pallas import tpu as pltpu

EPS = 1e-5
PAD = 8  # leading zero rows of the conv2 staging scratch (sublane aligned)


def _bn_train(h, gamma, beta):
    """Training-mode BatchNorm over rows: single-pass stats + fused scale/shift."""
    m = jnp.mean(h, axis=0, keepdims=True)
    msq = jnp.mean(h * h, axis=0, keepdims=True)
    scale = gamma * lax.rsqrt((msq - m * m) + EPS)
    return h * scale + (beta - m * scale)


def resnet_block_kernel(
    x_ref,                       # (N*L, C_in_padded)   f32
    mask_ref,                    # (N*L//2, 1)          f32  (t0 tap mask)
    w1_ref, g1_ref, be1_ref,     # conv1 weight (bf16) / bn1 (f32)
    w2_ref, g2_ref, be2_ref,     # conv2 stacked (3*C, C) bf16 / bn2
    w3_ref, g3_ref, be3_ref,     # conv3 weight (bf16) / bn3
    wr_ref, br_ref,              # conv_right weight (bf16) / bias (f32)
    out_ref,                     # (N*L//2, C_out)      f32
    h1s_ref,                     # scratch (PAD + N*L, C_out) f32
):
    rows_in = x_ref.shape[0]
    rows_out, c_out = out_ref.shape

    # ---------------- left branch ----------------
    # conv1 (k=1): one full-width bf16 MXU matmul over all N*L rows, f32 accum.
    # Conv bias b1 omitted: training-mode BN mean subtraction cancels it exactly.
    h1 = jnp.dot(x_ref[...].astype(jnp.bfloat16), w1_ref[...],
                 preferred_element_type=jnp.float32)
    h1 = _bn_train(h1, g1_ref[...], be1_ref[...])
    h1 = jnp.maximum(h1, 0.0)

    # Stage relu(bn1(conv1)) into an aligned f32 scratch with PAD leading zero rows
    # so the three conv2 taps become plain batched stride-2 reads.
    h1s_ref[pl.ds(0, PAD), :] = jnp.zeros((PAD, c_out), jnp.float32)
    h1s_ref[pl.ds(PAD, rows_in), :] = h1

    # conv2 (k=3, stride=2, padding=1): output row r reads flat input rows
    # 2r-1, 2r, 2r+1 (scratch rows PAD-1+2r, PAD+2r, PAD+1+2r).  The 2r-1 tap must
    # be zero at every in-batch t == 0; the precomputed mask handles that (for
    # b == 0 it also lands on the zero pad rows).
    t0 = h1s_ref[pl.ds(PAD - 1, rows_out, stride=2), :] * mask_ref[...]
    t1 = h1s_ref[pl.ds(PAD, rows_out, stride=2), :]
    t2 = h1s_ref[pl.ds(PAD + 1, rows_out, stride=2), :]

    # Fused taps: single K = 3*C_out MXU matmul against the pre-stacked w2
    # (accumulation over the three taps happens inside the MXU).  Bias b2 omitted
    # (cancelled by bn2).
    cat = jnp.concatenate([t0, t1, t2], axis=1).astype(jnp.bfloat16)
    h2 = jnp.dot(cat, w2_ref[...], preferred_element_type=jnp.float32)
    h2 = _bn_train(h2, g2_ref[...], be2_ref[...])
    h2 = jnp.maximum(h2, 0.0)

    # conv3 (k=1) -> bn3 (bias b3 cancelled by bn3).
    h3 = jnp.dot(h2.astype(jnp.bfloat16), w3_ref[...],
                 preferred_element_type=jnp.float32)
    h3 = _bn_train(h3, g3_ref[...], be3_ref[...])

    # ---------------- right branch ----------------
    # avg_pool(k=2, s=2) then conv_right (k=1, bias kept: no BN follows).  Pairs
    # never cross batch boundaries because L is even, so flat stride-2 reads of x
    # are exact.
    xe = x_ref[pl.ds(0, rows_out, stride=2), :]
    xo = x_ref[pl.ds(1, rows_out, stride=2), :]
    xp = ((xe + xo) * 0.5).astype(jnp.bfloat16)
    right = jnp.dot(xp, wr_ref[...], preferred_element_type=jnp.float32) + br_ref[...]

    out_ref[...] = h3 + right


def resnet_block(x, p):
    """x: (N, C_in, L) float32 -> (N, C_out, L//2) float32."""
    n, c_in, l = x.shape
    assert l % 2 == 0, "stride-2 conv / avg-pool expects even L"
    c_out = p["w1"].shape[1]
    l2 = l // 2
    rows_out = n * l2

    # channel-last, flatten (batch, length) onto rows.
    x2 = jnp.transpose(x, (0, 2, 1)).reshape(n * l, c_in)

    # Pad the C_in contraction dim to a multiple of 128 so the k=1 convs fill the
    # MXU lanes (zero rows in the weights keep the math identical).
    c_in_p = -(-c_in // 128) * 128
    w1, wr = p["w1"], p["wr"]
    if c_in_p != c_in:
        x2 = jnp.pad(x2, ((0, 0), (0, c_in_p - c_in)))
        w1 = jnp.pad(w1, ((0, c_in_p - c_in), (0, 0)))
        wr = jnp.pad(wr, ((0, c_in_p - c_in), (0, 0)))

    # bf16 weights for the MXU; accumulation stays f32 inside the kernel.
    w1 = w1.astype(jnp.bfloat16)
    wr = wr.astype(jnp.bfloat16)
    # conv2 taps pre-stacked into one (3*C_out, C_out) contraction matrix so the
    # kernel issues a single K=3*C_out matmul instead of three K=C_out passes.
    w2 = p["w2"].reshape(3 * c_out, c_out).astype(jnp.bfloat16)
    w3 = p["w3"].astype(jnp.bfloat16)

    # conv2 t0-tap mask: 0.0 at every in-batch t == 0 output row (precomputed here
    # instead of n-1 chained iota compares inside the kernel).
    row = jnp.arange(rows_out, dtype=jnp.int32)[:, None]
    mask = jnp.where(row % l2 == 0, 0.0, 1.0).astype(jnp.float32)

    args = (
        x2, mask,
        w1, p["g1"], p["be1"],
        w2, p["g2"], p["be2"],
        w3, p["g3"], p["be3"],
        wr, p["br"],
    )

    # VMEM budget: single-buffered residency (no grid -> no pipeline, no double
    # buffering) + scratch + headroom for f32 intermediates (h1/h2/h3, fused conv2
    # operand, BN temps).  Cap at ~80% of the chip's physical VMEM so Mosaic keeps
    # internal headroom (v7x: 64 MiB physical -> ~51 MiB; v5e/v6e: 128 MiB -> ~102).
    nbytes = lambda a: a.size * a.dtype.itemsize
    out_bytes = rows_out * c_out * 4
    scratch_bytes = (PAD + n * l) * c_out * 4
    vmem_need = sum(nbytes(a) for a in args) + out_bytes + scratch_bytes
    vmem_need += 8 * n * l * c_out * 4
    try:
        info = pltpu.get_tpu_info()
        vmem_cap = int(getattr(info, "vmem_capacity_bytes", 64 << 20))
    except Exception:
        vmem_cap = 64 << 20   # conservative (v7x-sized) fallback
    vmem_limit = int(min(max(vmem_need, 8 << 20), (vmem_cap * 4) // 5))

    # TODO(synk): for large N*L, tile rows over a ("parallel",) grid axis (>=512-row
    # tiles, halo handling for the conv2 t0 tap) with a two-phase BatchNorm
    # reduction so v7x's two TensorCores split the work and per-step VMEM stays
    # bounded; at these shapes one resident invocation is optimal.
    vspec = pl.BlockSpec(memory_space=pltpu.MemorySpace.VMEM)
    out = pl.pallas_call(
        resnet_block_kernel,
        in_specs=[vspec] * len(args),
        out_specs=vspec,
        out_shape=jax.ShapeDtypeStruct((rows_out, c_out), jnp.float32),
        scratch_shapes=[pltpu.VMEM((PAD + n * l, c_out), jnp.float32)],
        compiler_params=pltpu.CompilerParams(vmem_limit_bytes=vmem_limit),
    )(*args)

    return jnp.transpose(out.reshape(n, l2, c_out), (0, 2, 1))


def reference(x, p):
    """Pure-JAX reference: PyTorch semantics (with conv biases), same matmul
    precision (bf16 operands, f32 accumulation) as the kernel."""
    n, c_in, l = x.shape
    l2 = l // 2
    xc = jnp.transpose(x, (0, 2, 1))                       # (N, L, C_in) f32

    def bn(h, g, b):
        m = jnp.mean(h, axis=(0, 1), keepdims=True)
        v = jnp.mean((h - m) ** 2, axis=(0, 1), keepdims=True)
        return (h - m) * lax.rsqrt(v + EPS) * g + b

    w1 = p["w1"].astype(jnp.bfloat16)
    w2 = p["w2"].astype(jnp.bfloat16)
    w3 = p["w3"].astype(jnp.bfloat16)
    wr = p["wr"].astype(jnp.bfloat16)

    h = jnp.einsum("nlc,cd->nld", xc.astype(jnp.bfloat16), w1,
                   preferred_element_type=jnp.float32) + p["b1"]
    h = jnp.maximum(bn(h, p["g1"], p["be1"]), 0.0)
    hp = jnp.pad(h.astype(jnp.bfloat16), ((0, 0), (1, 1), (0, 0)))
    h2 = p["b2"] + sum(
        jnp.einsum("nlc,cd->nld", hp[:, k:k + 2 * l2 - 1:2, :], w2[k],
                   preferred_element_type=jnp.float32)
        for k in range(3))
    h2 = jnp.maximum(bn(h2, p["g2"], p["be2"]), 0.0)
    h3 = bn(jnp.einsum("nlc,cd->nld", h2.astype(jnp.bfloat16), w3,
                       preferred_element_type=jnp.float32) + p["b3"],
            p["g3"], p["be3"])
    xp = ((xc[:, 0::2, :] + xc[:, 1::2, :]) * 0.5).astype(jnp.bfloat16)
    right = jnp.einsum("nlc,cd->nld", xp, wr,
                       preferred_element_type=jnp.float32) + p["br"]
    return jnp.transpose(h3 + right, (0, 2, 1))


if __name__ == "__main__":
    C_IN, C_OUT, N, L = 64, 128, 2, 16

    key = jax.random.PRNGKey(0)
    ks = jax.random.split(key, 16)

    def rnd(k, shape, scale=0.1):
        return jax.random.normal(k, shape, jnp.float32) * scale

    # Deterministic synthetic parameters (kernel-friendly layouts):
    # torch conv weight (C_out, C_in, K) is stored here as (K, C_in, C_out) / (C_in, C_out).
    params = {
        "w1": rnd(ks[0], (C_IN, C_OUT)),
        "b1": rnd(ks[1], (1, C_OUT)),
        "g1": 1.0 + rnd(ks[2], (1, C_OUT)),
        "be1": rnd(ks[3], (1, C_OUT)),
        "w2": rnd(ks[4], (3, C_OUT, C_OUT)),
        "b2": rnd(ks[5], (1, C_OUT)),
        "g2": 1.0 + rnd(ks[6], (1, C_OUT)),
        "be2": rnd(ks[7], (1, C_OUT)),
        "w3": rnd(ks[8], (C_OUT, C_OUT)),
        "b3": rnd(ks[9], (1, C_OUT)),
        "g3": 1.0 + rnd(ks[10], (1, C_OUT)),
        "be3": rnd(ks[11], (1, C_OUT)),
        "wr": rnd(ks[12], (C_IN, C_OUT)),
        "br": rnd(ks[13], (1, C_OUT)),
    }
    x = jax.random.normal(ks[14], (N, C_IN, L), jnp.float32)

    out = resnet_block(x, params)
    jax.block_until_ready(out)

    ref = reference(x, params)
    err = float(jnp.max(jnp.abs(out - ref)))
    assert out.shape == (N, C_OUT, L // 2), out.shape
    assert err < 5e-3, f"max abs err {err}"

    print("KERNEL_OK")
</pallas_src>

<mosaic_0001>
module attributes {stable_mosaic.version = 11 : i64} {
  func.func @resnet_block_kernel(%arg0: memref<32x128xf32, #tpu.memory_space<vmem>>, %arg1: memref<16x1xf32, #tpu.memory_space<vmem>>, %arg2: memref<128x128xbf16, #tpu.memory_space<vmem>>, %arg3: memref<1x128xf32, #tpu.memory_space<vmem>>, %arg4: memref<1x128xf32, #tpu.memory_space<vmem>>, %arg5: memref<384x128xbf16, #tpu.memory_space<vmem>>, %arg6: memref<1x128xf32, #tpu.memory_space<vmem>>, %arg7: memref<1x128xf32, #tpu.memory_space<vmem>>, %arg8: memref<128x128xbf16, #tpu.memory_space<vmem>>, %arg9: memref<1x128xf32, #tpu.memory_space<vmem>>, %arg10: memref<1x128xf32, #tpu.memory_space<vmem>>, %arg11: memref<128x128xbf16, #tpu.memory_space<vmem>>, %arg12: memref<1x128xf32, #tpu.memory_space<vmem>>, %arg13: memref<16x128xf32, #tpu.memory_space<vmem>>, %arg14: memref<40x128xf32, #tpu.memory_space<vmem>>) attributes {dimension_semantics = [], scalar_prefetch = 0 : i64, scratch_operands = 1 : i64, tpu.core_type = #tpu.core_type<tc>} {
    %c0 = arith.constant 0 : index
    %c0_0 = arith.constant 0 : index
    %0 = vector.load %arg0[%c0, %c0_0] : memref<32x128xf32, #tpu.memory_space<vmem>>, vector<32x128xf32>
    %1 = arith.truncf %0 : vector<32x128xf32> to vector<32x128xbf16>
    %c0_1 = arith.constant 0 : index
    %c0_2 = arith.constant 0 : index
    %2 = vector.load %arg2[%c0_1, %c0_2] : memref<128x128xbf16, #tpu.memory_space<vmem>>, vector<128x128xbf16>
    %cst = arith.constant dense<0.000000e+00> : vector<32x128xf32>
    %3 = tpu.matmul %1, %2, %cst {dimension_numbers = #tpu.dot_dimension_numbers<[1], [0], [0], [1], [0, 0, 1, 1], [], []>} : vector<32x128xbf16>, vector<128x128xbf16>, vector<32x128xf32> -> vector<32x128xf32>
    %c0_3 = arith.constant 0 : index
    %c0_4 = arith.constant 0 : index
    %4 = vector.load %arg3[%c0_3, %c0_4] : memref<1x128xf32, #tpu.memory_space<vmem>>, vector<1x128xf32>
    %c0_5 = arith.constant 0 : index
    %c0_6 = arith.constant 0 : index
    %5 = vector.load %arg4[%c0_5, %c0_6] : memref<1x128xf32, #tpu.memory_space<vmem>>, vector<1x128xf32>
    %cst_7 = arith.constant dense<0.000000e+00> : vector<128xf32>
    %6 = vector.multi_reduction <add>, %3, %cst_7 [0] : vector<32x128xf32> to vector<128xf32>
    %7 = vector.shape_cast %6 : vector<128xf32> to vector<1x128xf32>
    %cst_8 = arith.constant 3.200000e+01 : f32
    %8 = vector.broadcast %cst_8 : f32 to vector<1x128xf32>
    %9 = arith.divf %7, %8 : vector<1x128xf32>
    %10 = arith.mulf %3, %3 : vector<32x128xf32>
    %cst_9 = arith.constant dense<0.000000e+00> : vector<128xf32>
    %11 = vector.multi_reduction <add>, %10, %cst_9 [0] : vector<32x128xf32> to vector<128xf32>
    %12 = vector.shape_cast %11 : vector<128xf32> to vector<1x128xf32>
    %cst_10 = arith.constant 3.200000e+01 : f32
    %13 = vector.broadcast %cst_10 : f32 to vector<1x128xf32>
    %14 = arith.divf %12, %13 : vector<1x128xf32>
    %15 = arith.mulf %9, %9 : vector<1x128xf32>
    %16 = arith.subf %14, %15 : vector<1x128xf32>
    %cst_11 = arith.constant 9.99999974E-6 : f32
    %17 = vector.broadcast %cst_11 : f32 to vector<1x128xf32>
    %18 = arith.addf %16, %17 : vector<1x128xf32>
    %19 = math.rsqrt %18 : vector<1x128xf32>
    %20 = arith.mulf %4, %19 : vector<1x128xf32>
    %21 = vector.broadcast %20 : vector<1x128xf32> to vector<32x128xf32>
    %22 = arith.mulf %3, %21 : vector<32x128xf32>
    %23 = arith.mulf %9, %20 : vector<1x128xf32>
    %24 = arith.subf %5, %23 : vector<1x128xf32>
    %25 = vector.broadcast %24 : vector<1x128xf32> to vector<32x128xf32>
    %26 = arith.addf %22, %25 : vector<32x128xf32>
    %cst_12 = arith.constant 0.000000e+00 : f32
    %27 = vector.broadcast %cst_12 : f32 to vector<32x128xf32>
    %28 = arith.maximumf %26, %27 : vector<32x128xf32>
    %cst_13 = arith.constant 0.000000e+00 : f32
    %29 = vector.broadcast %cst_13 : f32 to vector<8x128xf32>
    %c0_14 = arith.constant 0 : index
    %c0_15 = arith.constant 0 : index
    %30 = vector.load %arg14[%c0_14, %c0_15] : memref<40x128xf32, #tpu.memory_space<vmem>>, vector<8x128xf32>
    tpu.vector_store %arg14[%c0_14, %c0_15], %29 {strides = array<i32>} : memref<40x128xf32, #tpu.memory_space<vmem>>, vector<8x128xf32>,
    %c8 = arith.constant 8 : index
    %c0_16 = arith.constant 0 : index
    %31 = vector.load %arg14[%c8, %c0_16] : memref<40x128xf32, #tpu.memory_space<vmem>>, vector<32x128xf32>
    tpu.vector_store %arg14[%c8, %c0_16], %28 {strides = array<i32>} : memref<40x128xf32, #tpu.memory_space<vmem>>, vector<32x128xf32>,
    %c7 = arith.constant 7 : index
    %c0_17 = arith.constant 0 : index
    %32 = tpu.strided_load %arg14[%c7, %c0_17] {strides = array<i32: 2, 1>} : memref<40x128xf32, #tpu.memory_space<vmem>>, vector<16x128xf32>
    %c0_18 = arith.constant 0 : index
    %c0_19 = arith.constant 0 : index
    %33 = vector.load %arg1[%c0_18, %c0_19] : memref<16x1xf32, #tpu.memory_space<vmem>>, vector<16x1xf32>
    %34 = vector.broadcast %33 : vector<16x1xf32> to vector<16x128xf32>
    %35 = arith.mulf %32, %34 : vector<16x128xf32>
    %c8_20 = arith.constant 8 : index
    %c0_21 = arith.constant 0 : index
    %36 = tpu.strided_load %arg14[%c8_20, %c0_21] {strides = array<i32: 2, 1>} : memref<40x128xf32, #tpu.memory_space<vmem>>, vector<16x128xf32>
    %c9 = arith.constant 9 : index
    %c0_22 = arith.constant 0 : index
    %37 = tpu.strided_load %arg14[%c9, %c0_22] {strides = array<i32: 2, 1>} : memref<40x128xf32, #tpu.memory_space<vmem>>, vector<16x128xf32>
    %38 = tpu.concatenate %35, %36, %37 in 1 : vector<16x128xf32>, vector<16x128xf32>, vector<16x128xf32> -> vector<16x384xf32>
    %39 = arith.truncf %38 : vector<16x384xf32> to vector<16x384xbf16>
    %c0_23 = arith.constant 0 : index
    %c0_24 = arith.constant 0 : index
    %40 = vector.load %arg5[%c0_23, %c0_24] : memref<384x128xbf16, #tpu.memory_space<vmem>>, vector<384x128xbf16>
    %cst_25 = arith.constant dense<0.000000e+00> : vector<16x128xf32>
    %41 = tpu.matmul %39, %40, %cst_25 {dimension_numbers = #tpu.dot_dimension_numbers<[1], [0], [0], [1], [0, 0, 1, 1], [], []>} : vector<16x384xbf16>, vector<384x128xbf16>, vector<16x128xf32> -> vector<16x128xf32>
    %c0_26 = arith.constant 0 : index
    %c0_27 = arith.constant 0 : index
    %42 = vector.load %arg6[%c0_26, %c0_27] : memref<1x128xf32, #tpu.memory_space<vmem>>, vector<1x128xf32>
    %c0_28 = arith.constant 0 : index
    %c0_29 = arith.constant 0 : index
    %43 = vector.load %arg7[%c0_28, %c0_29] : memref<1x128xf32, #tpu.memory_space<vmem>>, vector<1x128xf32>
    %cst_30 = arith.constant dense<0.000000e+00> : vector<128xf32>
    %44 = vector.multi_reduction <add>, %41, %cst_30 [0] : vector<16x128xf32> to vector<128xf32>
    %45 = vector.shape_cast %44 : vector<128xf32> to vector<1x128xf32>
    %cst_31 = arith.constant 1.600000e+01 : f32
    %46 = vector.broadcast %cst_31 : f32 to vector<1x128xf32>
    %47 = arith.divf %45, %46 : vector<1x128xf32>
    %48 = arith.mulf %41, %41 : vector<16x128xf32>
    %cst_32 = arith.constant dense<0.000000e+00> : vector<128xf32>
    %49 = vector.multi_reduction <add>, %48, %cst_32 [0] : vector<16x128xf32> to vector<128xf32>
    %50 = vector.shape_cast %49 : vector<128xf32> to vector<1x128xf32>
    %cst_33 = arith.constant 1.600000e+01 : f32
    %51 = vector.broadcast %cst_33 : f32 to vector<1x128xf32>
    %52 = arith.divf %50, %51 : vector<1x128xf32>
    %53 = arith.mulf %47, %47 : vector<1x128xf32>
    %54 = arith.subf %52, %53 : vector<1x128xf32>
    %cst_34 = arith.constant 9.99999974E-6 : f32
    %55 = vector.broadcast %cst_34 : f32 to vector<1x128xf32>
    %56 = arith.addf %54, %55 : vector<1x128xf32>
    %57 = math.rsqrt %56 : vector<1x128xf32>
    %58 = arith.mulf %42, %57 : vector<1x128xf32>
    %59 = vector.broadcast %58 : vector<1x128xf32> to vector<16x128xf32>
    %60 = arith.mulf %41, %59 : vector<16x128xf32>
    %61 = arith.mulf %47, %58 : vector<1x128xf32>
    %62 = arith.subf %43, %61 : vector<1x128xf32>
    %63 = vector.broadcast %62 : vector<1x128xf32> to vector<16x128xf32>
    %64 = arith.addf %60, %63 : vector<16x128xf32>
    %cst_35 = arith.constant 0.000000e+00 : f32
    %65 = vector.broadcast %cst_35 : f32 to vector<16x128xf32>
    %66 = arith.maximumf %64, %65 : vector<16x128xf32>
    %67 = arith.truncf %66 : vector<16x128xf32> to vector<16x128xbf16>
    %c0_36 = arith.constant 0 : index
    %c0_37 = arith.constant 0 : index
    %68 = vector.load %arg8[%c0_36, %c0_37] : memref<128x128xbf16, #tpu.memory_space<vmem>>, vector<128x128xbf16>
    %cst_38 = arith.constant dense<0.000000e+00> : vector<16x128xf32>
    %69 = tpu.matmul %67, %68, %cst_38 {dimension_numbers = #tpu.dot_dimension_numbers<[1], [0], [0], [1], [0, 0, 1, 1], [], []>} : vector<16x128xbf16>, vector<128x128xbf16>, vector<16x128xf32> -> vector<16x128xf32>
    %c0_39 = arith.constant 0 : index
    %c0_40 = arith.constant 0 : index
    %70 = vector.load %arg9[%c0_39, %c0_40] : memref<1x128xf32, #tpu.memory_space<vmem>>, vector<1x128xf32>
    %c0_41 = arith.constant 0 : index
    %c0_42 = arith.constant 0 : index
    %71 = vector.load %arg10[%c0_41, %c0_42] : memref<1x128xf32, #tpu.memory_space<vmem>>, vector<1x128xf32>
    %cst_43 = arith.constant dense<0.000000e+00> : vector<128xf32>
    %72 = vector.multi_reduction <add>, %69, %cst_43 [0] : vector<16x128xf32> to vector<128xf32>
    %73 = vector.shape_cast %72 : vector<128xf32> to vector<1x128xf32>
    %cst_44 = arith.constant 1.600000e+01 : f32
    %74 = vector.broadcast %cst_44 : f32 to vector<1x128xf32>
    %75 = arith.divf %73, %74 : vector<1x128xf32>
    %76 = arith.mulf %69, %69 : vector<16x128xf32>
    %cst_45 = arith.constant dense<0.000000e+00> : vector<128xf32>
    %77 = vector.multi_reduction <add>, %76, %cst_45 [0] : vector<16x128xf32> to vector<128xf32>
    %78 = vector.shape_cast %77 : vector<128xf32> to vector<1x128xf32>
    %cst_46 = arith.constant 1.600000e+01 : f32
    %79 = vector.broadcast %cst_46 : f32 to vector<1x128xf32>
    %80 = arith.divf %78, %79 : vector<1x128xf32>
    %81 = arith.mulf %75, %75 : vector<1x128xf32>
    %82 = arith.subf %80, %81 : vector<1x128xf32>
    %cst_47 = arith.constant 9.99999974E-6 : f32
    %83 = vector.broadcast %cst_47 : f32 to vector<1x128xf32>
    %84 = arith.addf %82, %83 : vector<1x128xf32>
    %85 = math.rsqrt %84 : vector<1x128xf32>
    %86 = arith.mulf %70, %85 : vector<1x128xf32>
    %87 = vector.broadcast %86 : vector<1x128xf32> to vector<16x128xf32>
    %88 = arith.mulf %69, %87 : vector<16x128xf32>
    %89 = arith.mulf %75, %86 : vector<1x128xf32>
    %90 = arith.subf %71, %89 : vector<1x128xf32>
    %91 = vector.broadcast %90 : vector<1x128xf32> to vector<16x128xf32>
    %92 = arith.addf %88, %91 : vector<16x128xf32>
    %c0_48 = arith.constant 0 : index
    %c0_49 = arith.constant 0 : index
    %93 = tpu.strided_load %arg0[%c0_48, %c0_49] {strides = array<i32: 2, 1>} : memref<32x128xf32, #tpu.memory_space<vmem>>, vector<16x128xf32>
    %c1 = arith.constant 1 : index
    %c0_50 = arith.constant 0 : index
    %94 = tpu.strided_load %arg0[%c1, %c0_50] {strides = array<i32: 2, 1>} : memref<32x128xf32, #tpu.memory_space<vmem>>, vector<16x128xf32>
    %95 = arith.addf %93, %94 : vector<16x128xf32>
    %cst_51 = arith.constant 5.000000e-01 : f32
    %96 = vector.broadcast %cst_51 : f32 to vector<16x128xf32>
    %97 = arith.mulf %95, %96 : vector<16x128xf32>
    %98 = arith.truncf %97 : vector<16x128xf32> to vector<16x128xbf16>
    %c0_52 = arith.constant 0 : index
    %c0_53 = arith.constant 0 : index
    %99 = vector.load %arg11[%c0_52, %c0_53] : memref<128x128xbf16, #tpu.memory_space<vmem>>, vector<128x128xbf16>
    %cst_54 = arith.constant dense<0.000000e+00> : vector<16x128xf32>
    %100 = tpu.matmul %98, %99, %cst_54 {dimension_numbers = #tpu.dot_dimension_numbers<[1], [0], [0], [1], [0, 0, 1, 1], [], []>} : vector<16x128xbf16>, vector<128x128xbf16>, vector<16x128xf32> -> vector<16x128xf32>
    %c0_55 = arith.constant 0 : index
    %c0_56 = arith.constant 0 : index
    %101 = vector.load %arg12[%c0_55, %c0_56] : memref<1x128xf32, #tpu.memory_space<vmem>>, vector<1x128xf32>
    %102 = vector.broadcast %101 : vector<1x128xf32> to vector<16x128xf32>
    %103 = arith.addf %100, %102 : vector<16x128xf32>
    %104 = arith.addf %92, %103 : vector<16x128xf32>
    %c0_57 = arith.constant 0 : index
    %c0_58 = arith.constant 0 : index
    %105 = vector.load %arg13[%c0_57, %c0_58] : memref<16x128xf32, #tpu.memory_space<vmem>>, vector<16x128xf32>
    tpu.vector_store %arg13[%c0_57, %c0_58], %104 {strides = array<i32>} : memref<16x128xf32, #tpu.memory_space<vmem>>, vector<16x128xf32>,
    return
  }
}

</mosaic_0001>

<bundles_post_ra>
// kernel: tpu_custom_call.1
= control target key start
LH: loop header
LB: loop body
LE: loop exit
PB: predicated region body
PF: predicated region fallthrough
CT: control target
= control target key end

     0   :  { %18 = vsyncpa [#allocation4], 0  ;;  %s1453_s0 = inlined_call_operand.hbm [shape: f32[32,128], index: 0, kind: input, shape index: {}]   ;;  %s1454_s1 = inlined_call_operand.vmem [shape: f32[16,1], index: 1, kind: input, shape index: {}]   ;;  %s1455_s2 = inlined_call_operand.hbm [shape: bf16[128,128], index: 2, kind: input, shape index: {}]   ;;  %s1456_s3 = inlined_call_operand.vmem [shape: f32[1,128], index: 3, kind: input, shape index: {}]   ;;  %s1457_s4 = inlined_call_operand.vmem [shape: f32[1,128], index: 4, kind: input, shape index: {}]   ;;  %s1458_s5 = inlined_call_operand.hbm [shape: bf16[384,128], index: 5, kind: input, shape index: {}]   ;;  %s1459_s6 = inlined_call_operand.vmem [shape: f32[1,128], index: 6, kind: input, shape index: {}]   ;;  %s1460_s7 = inlined_call_operand.vmem [shape: f32[1,128], index: 7, kind: input, shape index: {}]   ;;  %s1461_s8 = inlined_call_operand.hbm [shape: bf16[128,128], index: 8, kind: input, shape index: {}]   ;;  %s1462_s9 = inlined_call_operand.vmem [shape: f32[1,128], index: 9, kind: input, shape index: {}]   ;;  %s1463_s10 = inlined_call_operand.vmem [shape: f32[1,128], index: 10, kind: input, shape index: {}]   ;;  %s1464_s11 = inlined_call_operand.hbm [shape: bf16[128,128], index: 11, kind: input, shape index: {}]   ;;  %s1465_s12 = inlined_call_operand.vmem [shape: f32[1,128], index: 12, kind: input, shape index: {}]   ;;  %s1466_s13 = inlined_call_operand.hbm [shape: f32[16,128], index: 13, kind: output, shape index: {}]  }
   0x1   :  { %19 = vsyncpa [#allocation7], 0 }
   0x2   :  { %20 = vsyncpa [#allocation10], 0  ;;  %s41_s27 = sshll.u32 %s1455_s2, 4  ;;  %s42_s27 = int_to_ptr.hbm [resolvable:$true] %s41_s27 }
   0x3   :  { %21 = vsyncpa [#allocation5], 0  ;;  %s1264_s28 = smov [#allocation6]   ;;  %s75_s15 = sshll.u32 %s1461_s8, 4  ;;  %s76_s15 = int_to_ptr.hbm [resolvable:$true] %s75_s15 }
   0x4   :  { %s43_s29 = sshll.u32 %s1264_s28, 4  ;;  %s1265_s16 = smov 64   ;;  %s44_s29 = int_to_ptr.vmem [resolvable:$true] %s43_s29 }
   0x5   :  { %s1266_s17 = smov 4   ;;  %s1267_s18 = smov [#allocation9]  }
   0x6   :  { %49 = dma.hbm_to_vmem [thread:$0]  %s42_s27, 1024, %s44_s29, [#allocation7], %s1265_s16, %s1265_s16, %s1266_s17  }
   0x7   :  { %s77_s19 = sshll.u32 %s1267_s18, 4  ;;  %s26_s21 = sshll.u32 %s1453_s0, 4  ;;  %s78_s19 = int_to_ptr.vmem [resolvable:$true] %s77_s19  ;;  %s27_s21 = int_to_ptr.hbm [resolvable:$true] %s26_s21 }
   0x8   :  { %83 = dma.hbm_to_vmem [thread:$0]  %s76_s15, 1024, %s78_s19, [#allocation10], %s1265_s16, %s1265_s16, %s1266_s17  }
   0x9   :  { %s1268_s8 = smov [#allocation3]   ;;  %s58_s25 = sshll.u32 %s1458_s5, 4  ;;  %s59_s25 = int_to_ptr.hbm [resolvable:$true] %s58_s25 }
   0xa   :  { %s28_s22 = sshll.u32 %s1268_s8, 4  ;;  %s1269_s26 = smov 128   ;;  %s29_s22 = int_to_ptr.vmem [resolvable:$true] %s28_s22 }
   0xb   :  { %s1270_s27 = smov 8   ;;  %s1271_s0 = smov [#allocation8]  }
   0xc   :  { %34 = dma.hbm_to_vmem [thread:$0]  %s27_s21, 512, %s29_s22, [#allocation4], %s1269_s26, %s1269_s26, %s1270_s27  }
   0xd   :  { %s60_s28 = sshll.u32 %s1271_s0, 4  ;;  %s92_s14 = sshll.u32 %s1464_s11, 4  ;;  %s61_s28 = int_to_ptr.vmem [resolvable:$true] %s60_s28  ;;  %s93_s14 = int_to_ptr.hbm [resolvable:$true] %s92_s14 }
   0xe   :  { %66 = dma.hbm_to_vmem [thread:$0]  %s59_s25, 3072, %s61_s28, [#allocation7], %s1265_s16, %s1265_s16, %s1266_s17  }
   0xf   :  { %s1272_s5 = smov [#allocation11]  }
  0x10   :  { %s94_s15 = sshll.u32 %s1272_s5, 4  ;;  %s95_s15 = int_to_ptr.vmem [resolvable:$true] %s94_s15 }
  0x11   :  { %100 = dma.hbm_to_vmem [thread:$0]  %s93_s14, 1024, %s95_s15, [#allocation10], %s1265_s16, %s1265_s16, %s1266_s17  }
  0x12   :  { %1256 = dma.done.wait [#allocation4], 512  }
  0x13   :  { %1257 = vsyncadd [#allocation4], 4294966784 }
  0x14   :  { %1258 = dma.done.wait [#allocation7], 4096  }
  0x15   :  { %1259 = vsyncadd [#allocation7], 4294963200 }
  0x16   :  { %1260 = dma.done.wait [#allocation10], 2048  }
  0x17   :  { %1261 = vsyncadd [#allocation10], 4294965248  ;;  %v1045_v0 = vld [vmem:[#allocation6 + $0x38] sm:$0xff]  ;;  %v1044_v1 = vld [vmem:[#allocation6 + $0x30] sm:$0xff]  ;;  %v1273_v7 = vmov 0   ;;  %v1274_v19 = vmov 32.0  }
  0x18   :  { %193 = vmatpush.bf16.msra.mxu0 %v1045_v0  ;;  %v1043_v2 = vld [vmem:[#allocation6 + $0x28] sm:$0xff]  ;;  %v1042_v3 = vld [vmem:[#allocation6 + $0x20] sm:$0xff]  ;;  %v1041_v4 = vld [vmem:[#allocation6 + $0x18] sm:$0xff]  ;;  %1100 = vset.pattern.permute.xlu0 %v1273_v7  ;;  %1102 = vrcp.f32 %v1274_v19 }
  0x19   :  { %v288_v5 = vld [vmem:[%s1454_s1] sm:$0xff]  ;;  %v1040_v6 = vld [vmem:[#allocation6 + $0x10] sm:$0xff]  ;;  %v1039_v8 = vld [vmem:[#allocation6 + $0x8] sm:$0xff] }
  0x1a   :  { %292 = vperm.xlu0 %1100, %v288_v5   ;;  %v289_v9 = vld [vmem:[%s1454_s1 + $0x8] sm:$0xff]  ;;  %v124_v12 = vld [vmem:[#allocation3 + $0x8] sm:$0xff]  ;;  %v125_v14 = vld [vmem:[#allocation3 + $0x10] sm:$0xff] }
  0x1b   :  { %v1038_v10 = vld [vmem:[#allocation6] sm:$0xff]  ;;  %v126_v15 = vld [vmem:[#allocation3 + $0x18] sm:$0xff]  ;;  %v1060_v42 = vld [vmem:[#allocation8 + $0x70] sm:$0xff] }
  0x1c   :  { %194 = vmatpush.bf16.msra.mxu0 %v1044_v1  ;;  %v123_v11 = vld [vmem:[#allocation3] sm:$0xff]  ;;  %v128_v16 = vpack.c.bf16 %v126_v15, %v125_v14  ;;  %v1061_v34 = vld [vmem:[#allocation8 + $0x78] sm:$0xff]  ;;  %v1068_v43 = vld [vmem:[#allocation8 + $0xb0] sm:$0xff] }
  0x1d   :  { %v127_v13 = vpack.c.bf16 %v124_v12, %v123_v11  ;;  %v1069_v35 = vld [vmem:[#allocation8 + $0xb8] sm:$0xff]  ;;  %519 = vmatpush.bf16.msra.mxu2 %v1061_v34  ;;  %v1052_v47 = vld [vmem:[#allocation8 + $0x30] sm:$0xff]  ;;  %v1059_v50 = vld [vmem:[#allocation8 + $0x68] sm:$0xff] }
  0x1e   :  { %v1103_v21 = vpop.eup %1102  ;;  %533 = vmatpush.bf16.msra.mxu3 %v1069_v35  ;;  %v1053_v39 = vld [vmem:[#allocation8 + $0x38] sm:$0xff]  ;;  %v1067_v51 = vld [vmem:[#allocation8 + $0xa8] sm:$0xff]  ;;  %v1058_v58 = vld [vmem:[#allocation8 + $0x60] sm:$0xff] }
  0x1f   :  { %v224_v23 = vmul.f32 32.0, %v1103_v21  ;;  %505 = vmatpush.bf16.msra.mxu1 %v1053_v39  ;;  %vm228_vm0 = vweird.f32 %v1103_v21  ;;  %v1051_v55 = vld [vmem:[#allocation8 + $0x28] sm:$0xff]  ;;  %v1066_v59 = vld [vmem:[#allocation8 + $0xa0] sm:$0xff]  ;;  %v1057_v1 = vld [vmem:[#allocation8 + $0x58] sm:$0xff] }
  0x20   :  { %195 = vmatpush.bf16.msra.mxu0 %v1043_v2  ;;  %v1050_v62 = vld [vmem:[#allocation8 + $0x20] sm:$0xff]  ;;  %v1065_v2 = vld [vmem:[#allocation8 + $0x98] sm:$0xff]  ;;  %v1064_v7 = vld [vmem:[#allocation8 + $0x90] sm:$0xff] }
  0x21   :  { %v225_v30 = vsub.f32 1.0, %v224_v23  ;;  %520 = vmatpush.bf16.msra.mxu2 %v1060_v42  ;;  %v1063_v11 = vld [vmem:[#allocation8 + $0x88] sm:$0xff]  ;;  %v1054_v15 = vld [vmem:[#allocation8 + $0x40] sm:$0xff] }
  0x22   :  { %297 = vperm.xlu0 %1100, %v289_v9   ;;  %534 = vmatpush.bf16.msra.mxu3 %v1068_v43  ;;  %v1275_v9 = vmov 0.0   ;;  %v1047_v12 = vld [vmem:[#allocation8 + $0x8] sm:$0xff] }
  0x23   :  { %v226_v38 = vmul.f32 %v1103_v21, %v225_v30  ;;  %506 = vmatpush.bf16.msra.mxu1 %v1052_v47  ;;  %279 = vst [vmem:[#allocation2] sm:$0xff] %v1275_v9 }
  0x24   :  { %196 = vmatpush.bf16.msra.mxu0 %v1042_v3 }
  0x25   :  { %v227_v46 = vadd.f32 %v1103_v21, %v226_v38  ;;  %521 = vmatpush.bf16.msra.mxu2 %v1059_v50 }
  0x26   :  { %535 = vmatpush.bf16.msra.mxu3 %v1067_v51 }
  0x27   :  { %v229_v54 = vsel %vm228_vm0, %v1103_v21, %v227_v46  ;;  %507 = vmatpush.bf16.msra.mxu1 %v1051_v55  ;;  %v1046_v21 = vld [vmem:[#allocation8] sm:$0xff] }
  0x28   :  { %197 = vmatpush.bf16.msra.mxu0 %v1041_v4  ;;  %v1049_v4 = vld [vmem:[#allocation8 + $0x18] sm:$0xff] }
  0x29   :  { %522 = vmatpush.bf16.msra.mxu2 %v1058_v58 }
  0x2a   :  { %536 = vmatpush.bf16.msra.mxu3 %v1066_v59  ;;  %v1077_v59 = vld [vmem:[#allocation9 + $0x38] sm:$0xff] }
  0x2b   :  { %508 = vmatpush.bf16.msra.mxu1 %v1050_v62  ;;  %v1076_v62 = vld [vmem:[#allocation9 + $0x30] sm:$0xff] }
  0x2c   :  { %198 = vmatpush.bf16.msra.mxu0 %v1040_v6  ;;  %v1056_v6 = vld [vmem:[#allocation8 + $0x50] sm:$0xff] }
  0x2d   :  { %523 = vmatpush.bf16.msra.mxu2 %v1057_v1 }
  0x2e   :  { %537 = vmatpush.bf16.msra.mxu3 %v1065_v2 }
  0x2f   :  { %509 = vmatpush.bf16.msra.mxu1 %v1049_v4 }
  0x30   :  { %199 = vmatpush.bf16.msra.mxu0 %v1039_v8  ;;  %v1048_v8 = vld [vmem:[#allocation8 + $0x10] sm:$0xff] }
  0x31   :  { %524 = vmatpush.bf16.msra.mxu2 %v1056_v6 }
  0x32   :  { %538 = vmatpush.bf16.msra.mxu3 %v1064_v7 }
  0x33   :  { %510 = vmatpush.bf16.msra.mxu1 %v1048_v8 }
  0x34   :  { %200 = vmatpush.bf16.msra.mxu0 %v1038_v10  ;;  %v1055_v10 = vld [vmem:[#allocation8 + $0x48] sm:$0xff] }
  0x35   :  { %525 = vmatpush.bf16.msra.mxu2 %v1055_v10 }
  0x36   :  { %539 = vmatpush.bf16.msra.mxu3 %v1063_v11  ;;  %v1074_v11 = vld [vmem:[#allocation9 + $0x20] sm:$0xff] }
  0x37   :  { %201 = vmatmul.bf16.vlgmr.msra.gmra.mxu0 %v127_v13  ;;  %511 = vmatpush.bf16.msra.mxu1 %v1047_v12 }
  0x38   :  { %667 = vmatpush.bf16.msrb.mxu0 %v1077_v59 }
  0x39   :  { %526 = vmatpush.bf16.msra.mxu2 %v1054_v15 }
  0x3b   :  { %512 = vmatpush.bf16.msra.mxu1 %v1046_v21 }
  0x3c   :  { %668 = vmatpush.bf16.msrb.mxu0 %v1076_v62  ;;  %v1079_v62 = vld [vmem:[#allocation11 + $0x8] sm:$0xff] }
  0x47   :  { %206 = vmatmul.bf16.gmra.mxu0 %v128_v16  ;;  %v1062_v16 = vld [vmem:[#allocation8 + $0x80] sm:$0xff] }
  0x48   :  { %540 = vmatpush.bf16.msra.mxu3 %v1062_v16 }
  0x8c   :  { %v293_v46 = vpop.permute.xlu0 %292 }
  0xb4   :  { %v1384_v17 = vpop.f32.mrf.mxu0 }
  0xb5   :  { %v231_v24 = vmul.f32 %v1384_v17, %v1384_v17 }
  0xbc   :  { %v1386_v18 = vpop.f32.mrf.mxu0 }
  0xbd   :  { %v232_v22 = vmul.f32 %v1386_v18, %v1386_v18  ;;  %v214_v25 = vadd.f32 %v1386_v18, %v1384_v17 }
  0xbf   :  { %v235_v27 = vadd.f32 %v232_v22, %v231_v24  ;;  %v212_v24 = vld [vmem:[%s1456_s3] sm:$0x1] }
  0xc4   :  { %v1388_v20 = vpop.f32.mrf.mxu0 }
  0xc5   :  { %v233_v26 = vmul.f32 %v1388_v20, %v1388_v20  ;;  %v215_v28 = vadd.f32 %v214_v25, %v1388_v20 }
  0xc7   :  { %v236_v31 = vadd.f32 %v235_v27, %v233_v26 }
  0xcc   :  { %v1399_v29 = vpop.f32.mrf.mxu0 }
  0xcd   :  { %v216_v32 = vadd.f32 %v215_v28, %v1399_v29  ;;  %v234_v33 = vmul.f32 %v1399_v29, %v1399_v29  ;;  %v213_v28 = vld [vmem:[%s1457_s4] sm:$0x1] }
  0xcf   :  { %v217_v36 = vrot.slane %v216_v32, 4  ;;  %v237_v37 = vadd.f32 %v236_v31, %v234_v33 }
  0xd1   :  { %v218_v40 = vadd.f32 %v217_v36, %v216_v32  ;;  %v238_v41 = vrot.slane %v237_v37, 4 }
  0xd3   :  { %v219_v44 = vrot.slane %v218_v40, 2  ;;  %v239_v45 = vadd.f32 %v238_v41, %v237_v37 }
  0xd5   :  { %v220_v48 = vadd.f32 %v219_v44, %v218_v40  ;;  %v240_v49 = vrot.slane %v239_v45, 2 }
  0xd7   :  { %v221_v52 = vrot.slane %v220_v48, 1  ;;  %v241_v53 = vadd.f32 %v240_v49, %v239_v45 }
  0xd9   :  { %v222_v56 = vadd.f32 %v221_v52, %v220_v48  ;;  %v242_v57 = vrot.slane %v241_v53, 1  ;;  %v298_v48 = vpop.permute.xlu0 %297 }
  0xdb   :  { %v230_v60 = vmul.f32 %v229_v54, %v222_v56  ;;  %v243_v61 = vadd.f32 %v242_v57, %v241_v53  ;;  %v1276_v56 = vmov 16.0  }
  0xdd   :  { %v244_v63 = vmul.f32 %v243_v61, %v229_v54  ;;  %v245_v0 = vmul.f32 %v230_v60, %v230_v60 }
  0xdf   :  { %v246_v3 = vsub.f32 %v244_v63, %v245_v0 }
  0xe1   :  { %v247_v5 = vadd.f32 1e-05, %v246_v3 }
  0xe3   :  { %1104 = vrsqrt.f32 %v247_v5  ;;  %vm254_vm2 = vweird.f32 %v247_v5 }
  0xe4   :  { %1106 = vrcp.f32 %v1276_v56  ;;  %v548_v56 = vld [vmem:[%s1460_s7] sm:$0x1] }
  0xe9   :  { %v1105_v13 = vpop.eup %1104 }
  0xea   :  { %v249_v14 = vmul.f32 %v1105_v13, %v247_v5  ;;  %vm255_vm1 = vweird.f32 %v1105_v13  ;;  %v1075_v5 = vld [vmem:[#allocation9 + $0x28] sm:$0xff] }
  0xeb   :  { %vm256_vm3 = vmor %vm254_vm2, %vm255_vm1  ;;  %669 = vmatpush.bf16.msrb.mxu0 %v1075_v5 }
  0xec   :  { %v250_v19 = vmul.f32 %v1105_v13, %v249_v14 }
  0xee   :  { %v251_v22 = vmul.f32 0.5, %v250_v19  ;;  %v1073_v19 = vld [vmem:[#allocation9 + $0x18] sm:$0xff] }
  0xef   :  { %670 = vmatpush.bf16.msrb.mxu0 %v1074_v11 }
  0xf0   :  { %v252_v23 = vsub.f32 1.5, %v251_v22 }
  0xf2   :  { %v253_v25 = vmul.f32 %v1105_v13, %v252_v23 }
  0xf3   :  { %671 = vmatpush.bf16.msrb.mxu0 %v1073_v19 }
  0xf4   :  { %v257_v26 = vsel %vm256_vm3, %v1105_v13, %v253_v25 }
  0xf5   :  { %v258_v27 = vmul.f32 %v257_v26, %v212_v24  ;;  %v1072_v26 = vld [vmem:[#allocation9 + $0x10] sm:$0xff] }
  0xf7   :  { %v260_v30 = vperm.slane %v258_v27, 0  ;;  %v266_v31 = vmul.f32 %v258_v27, %v230_v60  ;;  %v1107_v60 = vpop.eup %1106  ;;  %672 = vmatpush.bf16.msrb.mxu0 %v1072_v26 }
  0xf8   :  { %v557_v1 = vmul.f32 16.0, %v1107_v60  ;;  %vm561_vm4 = vweird.f32 %v1107_v60 }
  0xf9   :  { %v267_v32 = vsub.f32 %v213_v28, %v266_v31  ;;  %v262_v33 = vmul.f32 %v260_v30, %v1384_v17  ;;  %v263_v34 = vmul.f32 %v260_v30, %v1386_v18  ;;  %v264_v35 = vmul.f32 %v260_v30, %v1388_v20 }
  0xfa   :  { %v265_v36 = vmul.f32 %v260_v30, %v1399_v29  ;;  %v558_v7 = vsub.f32 1.0, %v557_v1 }
  0xfb   :  { %v269_v37 = vperm.slane %v267_v32, 0 }
  0xfc   :  { %v559_v14 = vmul.f32 %v1107_v60, %v558_v7 }
  0xfd   :  { %v271_v38 = vadd.f32 %v269_v37, %v262_v33  ;;  %v272_v39 = vadd.f32 %v269_v37, %v263_v34  ;;  %v273_v40 = vadd.f32 %v269_v37, %v264_v35  ;;  %v274_v41 = vadd.f32 %v269_v37, %v265_v36  ;;  %v1071_v33 = vld [vmem:[#allocation9 + $0x8] sm:$0xff]  ;;  %v1070_v36 = vld [vmem:[#allocation9] sm:$0xff] }
  0xfe   :  { %v560_v23 = vadd.f32 %v1107_v60, %v559_v14  ;;  %673 = vmatpush.bf16.msrb.mxu0 %v1071_v33 }
  0xff   :  { %v275_v42 = vmax.f32 %v271_v38, 0.0  ;;  %v276_v43 = vmax.f32 %v272_v39, 0.0  ;;  %v277_v44 = vmax.f32 %v273_v40, 0.0  ;;  %v278_v45 = vmax.f32 %v274_v41, 0.0  ;;  %v1085_v41 = vld [vmem:[#allocation11 + $0x38] sm:$0xff] }
 0x100   :  { %v1424_v30 = vsel %vm561_vm4, %v1107_v60, %v560_v23  ;;  %807 = vmatpush.bf16.msrb.mxu1 %v1085_v41 }
 0x101   :  { %280 = vst [vmem:[#allocation2 + $0x8] sm:$0xff] %v275_v42  ;;  %v1084_v42 = vld [vmem:[#allocation11 + $0x30] sm:$0xff] }
 0x102   :  { %281 = vst [vmem:[#allocation2 + $0x10] sm:$0xff] %v276_v43  ;;  %674 = vmatpush.bf16.msrb.mxu0 %v1070_v36 }
 0x103   :  { %282 = vst [vmem:[#allocation2 + $0x18] sm:$0xff] %v277_v44  ;;  %v1083_v44 = vld [vmem:[#allocation11 + $0x28] sm:$0xff] }
 0x104   :  { %283 = vst [vmem:[#allocation2 + $0x20] sm:$0xff] %v278_v45  ;;  %808 = vmatpush.bf16.msrb.mxu1 %v1084_v42 }
 0x108   :  { %809 = vmatpush.bf16.msrb.mxu1 %v1083_v44 }
 0x109   :  { %v285_v17 = vld [vmem:[#allocation2 + $0x7] ss:$2 sm:$0xff]  ;;  %v303_v18 = vld [vmem:[#allocation2 + $0x8] ss:$2 sm:$0xff] }
 0x10a   :  { %v307_v47 = vld [vmem:[#allocation2 + $0x9] ss:$2 sm:$0xff]  ;;  %v300_v20 = vmul.f32 %v293_v46, %v285_v17 }
 0x10b   :  { %v287_v29 = vld [vmem:[#allocation2 + $0x17] ss:$2 sm:$0xff]  ;;  %v305_v49 = vld [vmem:[#allocation2 + $0x18] ss:$2 sm:$0xff]  ;;  %v1082_v17 = vld [vmem:[#allocation11 + $0x20] sm:$0xff] }
 0x10c   :  { %v309_v50 = vld [vmem:[#allocation2 + $0x19] ss:$2 sm:$0xff]  ;;  %v301_v51 = vmul.f32 %v298_v48, %v287_v29  ;;  %v311_v52 = vpack.c.bf16 %v305_v49, %v303_v18  ;;  %810 = vmatpush.bf16.msrb.mxu1 %v1082_v17  ;;  %v547_v48 = vld [vmem:[%s1459_s6] sm:$0x1] }
 0x10d   :  { %v312_v53 = vpack.c.bf16 %v309_v50, %v307_v47  ;;  %v1080_v50 = vld [vmem:[#allocation11 + $0x10] sm:$0xff] }
 0x10e   :  { %527 = vmatmul.bf16.vlgmr.msra.gmra.mxu2 %v311_v52  ;;  %v310_v54 = vpack.c.bf16 %v301_v51, %v300_v20  ;;  %v1081_v20 = vld [vmem:[#allocation11 + $0x18] sm:$0xff]  ;;  %v727_v51 = vld [vmem:[#allocation3] ss:$2 sm:$0xff] }
 0x10f   :  { %541 = vmatmul.bf16.vlgmr.msra.gmra.mxu3 %v312_v53  ;;  %v729_v53 = vld [vmem:[#allocation3 + $0x10] ss:$2 sm:$0xff] }
 0x110   :  { %513 = vmatmul.bf16.vlgmr.msra.gmra.mxu1 %v310_v54  ;;  %v731_v54 = vld [vmem:[#allocation3 + $0x1] ss:$2 sm:$0xff] }
 0x111   :  { %811 = vmatpush.bf16.msrb.mxu1 %v1081_v20  ;;  %v734_v59 = vadd.f32 %v731_v54, %v727_v51 }
 0x115   :  { %812 = vmatpush.bf16.msrb.mxu1 %v1080_v50 }
 0x119   :  { %813 = vmatpush.bf16.msrb.mxu1 %v1079_v62 }
 0x18d   :  { %v514_v55 = vpop.f32.mrf.mxu1 }
 0x191   :  { %v528_v57 = vpop.f32.mrf.mxu2 }
 0x192   :  { %v542_v58 = vpop.f32.mrf.mxu3  ;;  %v529_v61 = vadd.f32 %v528_v57, %v514_v55  ;;  %v733_v55 = vld [vmem:[#allocation3 + $0x11] ss:$2 sm:$0xff] }
 0x193   :  { %v735_v60 = vadd.f32 %v733_v55, %v729_v53 }
 0x194   :  { %v1414_v2 = vadd.f32 %v542_v58, %v529_v61 }
 0x195   :  { %v516_v63 = vpop.f32.mrf.mxu1 }
 0x196   :  { %v564_v8 = vmul.f32 %v1414_v2, %v1414_v2 }
 0x199   :  { %v530_v0 = vpop.f32.mrf.mxu2 }
 0x19a   :  { %v531_v3 = vadd.f32 %v530_v0, %v516_v63  ;;  %v544_v4 = vpop.f32.mrf.mxu3 }
 0x19c   :  { %v1416_v6 = vadd.f32 %v544_v4, %v531_v3  ;;  %v736_v3 = vmul.f32 0.5, %v734_v59  ;;  %v737_v4 = vmul.f32 0.5, %v735_v60 }
 0x19e   :  { %v549_v9 = vadd.f32 %v1416_v6, %v1414_v2  ;;  %v565_v10 = vmul.f32 %v1416_v6, %v1416_v6  ;;  %v738_v11 = vpack.c.bf16 %v737_v4, %v736_v3 }
 0x1a0   :  { %v550_v12 = vrot.slane %v549_v9, 4  ;;  %v566_v13 = vadd.f32 %v565_v10, %v564_v8  ;;  %v1078_v8 = vld [vmem:[#allocation11] sm:$0xff] }
 0x1a1   :  { %814 = vmatpush.bf16.msrb.mxu1 %v1078_v8 }
 0x1a2   :  { %v551_v15 = vadd.f32 %v550_v12, %v549_v9  ;;  %v567_v16 = vrot.slane %v566_v13, 4 }
 0x1a4   :  { %v552_v21 = vrot.slane %v551_v15, 2  ;;  %v568_v22 = vadd.f32 %v567_v16, %v566_v13  ;;  %815 = vmatmul.bf16.vlgmr.msrb.gmra.mxu1 %v738_v11 }
 0x1a6   :  { %v553_v24 = vadd.f32 %v552_v21, %v551_v15  ;;  %v569_v25 = vrot.slane %v568_v22, 2 }
 0x1a8   :  { %v554_v27 = vrot.slane %v553_v24, 1  ;;  %v570_v28 = vadd.f32 %v569_v25, %v568_v22 }
 0x1aa   :  { %v555_v31 = vadd.f32 %v554_v27, %v553_v24  ;;  %v571_v32 = vrot.slane %v570_v28, 1 }
 0x1ac   :  { %v563_v34 = vmul.f32 %v1424_v30, %v555_v31  ;;  %v572_v35 = vadd.f32 %v571_v32, %v570_v28 }
 0x1ae   :  { %v573_v37 = vmul.f32 %v572_v35, %v1424_v30  ;;  %v574_v38 = vmul.f32 %v563_v34, %v563_v34 }
 0x1b0   :  { %v575_v39 = vsub.f32 %v573_v37, %v574_v38 }
 0x1b2   :  { %v576_v40 = vadd.f32 1e-05, %v575_v39 }
 0x1b4   :  { %1108 = vrsqrt.f32 %v576_v40  ;;  %vm583_vm6 = vweird.f32 %v576_v40 }
 0x1ba   :  { %v1109_v43 = vpop.eup %1108 }
 0x1bb   :  { %v578_v45 = vmul.f32 %v1109_v43, %v576_v40  ;;  %vm584_vm5 = vweird.f32 %v1109_v43 }
 0x1bc   :  { %vm585_vm7 = vmor %vm583_vm6, %vm584_vm5 }
 0x1bd   :  { %v579_v46 = vmul.f32 %v1109_v43, %v578_v45  ;;  %v681_v45 = vld [vmem:[%s1462_s9] sm:$0x1]  ;;  %s1277_s9 = smov [#allocation12]  }
 0x1be   :  { %s829_s0 = sshll.u32 %s1277_s9, 4  ;;  %s830_s0 = int_to_ptr.vmem [resolvable:$true] %s829_s0 }
 0x1bf   :  { %v580_v18 = vmul.f32 0.5, %v579_v46 }
 0x1c1   :  { %v581_v47 = vsub.f32 1.5, %v580_v18  ;;  %v682_v18 = vld [vmem:[%s1463_s10] sm:$0x1]  ;;  %s831_s10 = sshll.u32 %s1466_s13, 4  ;;  %s832_s10 = int_to_ptr.hbm [resolvable:$true] %s831_s10 }
 0x1c3   :  { %v582_v29 = vmul.f32 %v1109_v43, %v581_v47 }
 0x1c5   :  { %v586_v49 = vsel %vm585_vm7, %v1109_v43, %v582_v29  ;;  %v1101_v29 = vld [vmem:[%s1465_s12] ss:$0 sm:$0xff] }
 0x1c6   :  { %v587_v52 = vmul.f32 %v586_v49, %v547_v48 }
 0x1c8   :  { %v589_v57 = vperm.slane %v587_v52, 0  ;;  %v593_v58 = vmul.f32 %v587_v52, %v563_v34 }
 0x1ca   :  { %v594_v61 = vsub.f32 %v548_v56, %v593_v58  ;;  %v592_v63 = vmul.f32 %v589_v57, %v1416_v6  ;;  %v591_v0 = vmul.f32 %v589_v57, %v1414_v2 }
 0x1cc   :  { %v596_v1 = vperm.slane %v594_v61, 0 }
 0x1ce   :  { %v598_v5 = vadd.f32 %v596_v1, %v591_v0  ;;  %v599_v7 = vadd.f32 %v596_v1, %v592_v63 }
 0x1d0   :  { %v600_v9 = vmax.f32 %v598_v5, 0.0  ;;  %v601_v10 = vmax.f32 %v599_v7, 0.0 }
 0x1d2   :  { %v602_v12 = vpack.c.bf16 %v601_v10, %v600_v9 }
 0x1d4   :  { %675 = vmatmul.bf16.vlgmr.msrb.gmra.mxu0 %v602_v12 }
 0x221   :  { %v816_v44 = vpop.f32.mrf.mxu1 }
 0x222   :  { %v817_v55 = vadd.f32 %v1101_v29, %v816_v44 }
 0x229   :  { %v818_v49 = vpop.f32.mrf.mxu1 }
 0x22a   :  { %v819_v56 = vadd.f32 %v1101_v29, %v818_v49 }
 0x251   :  { %v676_v13 = vpop.f32.mrf.mxu0 }
 0x252   :  { %v691_v15 = vmul.f32 %v676_v13, %v676_v13 }
 0x259   :  { %v678_v14 = vpop.f32.mrf.mxu0 }
 0x25a   :  { %v683_v6 = vadd.f32 %v678_v14, %v676_v13  ;;  %v692_v16 = vmul.f32 %v678_v14, %v678_v14 }
 0x25c   :  { %v684_v2 = vrot.slane %v683_v6, 4  ;;  %v693_v19 = vadd.f32 %v692_v16, %v691_v15 }
 0x25e   :  { %v685_v21 = vadd.f32 %v684_v2, %v683_v6  ;;  %v694_v22 = vrot.slane %v693_v19, 4 }
 0x260   :  { %v686_v23 = vrot.slane %v685_v21, 2  ;;  %v695_v24 = vadd.f32 %v694_v22, %v693_v19 }
 0x262   :  { %v687_v25 = vadd.f32 %v686_v23, %v685_v21  ;;  %v696_v26 = vrot.slane %v695_v24, 2 }
 0x264   :  { %v688_v27 = vrot.slane %v687_v25, 1  ;;  %v697_v28 = vadd.f32 %v696_v26, %v695_v24 }
 0x266   :  { %v689_v31 = vadd.f32 %v688_v27, %v687_v25  ;;  %v698_v32 = vrot.slane %v697_v28, 1 }
 0x268   :  { %v690_v33 = vmul.f32 %v689_v31, %v1424_v30  ;;  %v699_v34 = vadd.f32 %v698_v32, %v697_v28 }
 0x26a   :  { %v700_v35 = vmul.f32 %v699_v34, %v1424_v30  ;;  %v701_v36 = vmul.f32 %v690_v33, %v690_v33 }
 0x26c   :  { %v702_v37 = vsub.f32 %v700_v35, %v701_v36 }
 0x26e   :  { %v703_v38 = vadd.f32 1e-05, %v702_v37 }
 0x270   :  { %1110 = vrsqrt.f32 %v703_v38  ;;  %vm710_vm9 = vweird.f32 %v703_v38 }
 0x276   :  { %v1111_v39 = vpop.eup %1110 }
 0x277   :  { %v705_v40 = vmul.f32 %v1111_v39, %v703_v38  ;;  %vm711_vm8 = vweird.f32 %v1111_v39 }
 0x278   :  { %vm712_vm10 = vmor %vm710_vm9, %vm711_vm8 }
 0x279   :  { %v706_v41 = vmul.f32 %v1111_v39, %v705_v40 }
 0x27b   :  { %v707_v42 = vmul.f32 0.5, %v706_v41 }
 0x27d   :  { %v708_v43 = vsub.f32 1.5, %v707_v42 }
 0x27f   :  { %v709_v46 = vmul.f32 %v1111_v39, %v708_v43 }
 0x281   :  { %v713_v17 = vsel %vm712_vm10, %v1111_v39, %v709_v46 }
 0x282   :  { %v714_v30 = vmul.f32 %v713_v17, %v681_v45 }
 0x284   :  { %v716_v47 = vperm.slane %v714_v30, 0  ;;  %v720_v20 = vmul.f32 %v714_v30, %v690_v33 }
 0x286   :  { %v721_v48 = vsub.f32 %v682_v18, %v720_v20  ;;  %v718_v50 = vmul.f32 %v716_v47, %v676_v13  ;;  %v719_v51 = vmul.f32 %v716_v47, %v678_v14 }
 0x288   :  { %v723_v52 = vperm.slane %v721_v48, 0 }
 0x28a   :  { %v726_v53 = vadd.f32 %v723_v52, %v719_v51  ;;  %v725_v54 = vadd.f32 %v723_v52, %v718_v50 }
 0x28c   :  { %v821_v57 = vadd.f32 %v817_v55, %v725_v54  ;;  %v822_v58 = vadd.f32 %v819_v56, %v726_v53 }
 0x28e   :  { %823 = vst [vmem:[#allocation12] sm:$0xff] %v821_v57 }
 0x28f   :  { %824 = vst [vmem:[#allocation12 + $0x8] sm:$0xff] %v822_v58 }
 0x290   :  { %837 = dma.vmem_to_hbm [thread:$0]  %s830_s0, 256, %s832_s10, [#allocation5], %s1269_s26, %s1269_s26, %s1270_s27  }
 0x291   :  { %1262 = dma.done.wait [#allocation5], 256  }
 0x292   :  { %1263 = vsyncadd [#allocation5], 4294967040 }
 0x293   :  { %842 = vsyncpa [#allocation4], 1 }
 0x294   :  { %843 = vsyncpa [#allocation7], 1 }
 0x295   :  { %844 = vsyncpa [#allocation10], 1 }
 0x296   :  { %845 = vsyncpa [#allocation5], 1 }

</bundles_post_ra>
